<compile_context>
chip_gen: v6e
topology: v6e:2x2x1
jax: 0.10.0
libtpu: 0.0.40
codegen_flags: <defaults>
</compile_context>

<pallas_src>
import jax
import jax.numpy as jnp
from jax.experimental import pallas as pl
from jax.experimental.pallas import tpu as pltpu


STREAM_DTYPE = jnp.bfloat16   # HBM dtype for the three streamed tensors


# --------------------------------------------------------------------------
# Kernel
# --------------------------------------------------------------------------
def fm_loss_kernel(t_ref, trg_ref, noise_ref, lw_ref,
                   w1t_ref, b1_ref, wt_ref, w2t_ref, b2_ref,
                   part_ref):
    tb = trg_ref.shape[0]

    # Streamed tensors (bf16 in HBM) -> f32 once at load; all math below f32.
    x1 = trg_ref[...].astype(jnp.float32)       # (TB, C, HWt)  target == x_1
    x0 = noise_ref[...].astype(jnp.float32)     # (TB, C, HWt)  noise  == x_0
    lw = lw_ref[...].astype(jnp.float32)        # (TB, C, HWt)  loss weight
    t = t_ref[...]                              # (TB, 1, 1)    f32

    # CondOT probability path sample (whole-block elementwise -> full sublanes).
    x_t = (1.0 - t) * x0 + t * x1               # path_sample.x_t
    u_t = x1 - x0                               # path_sample.dx_t

    # Stand-in backbone: time-conditioned point-wise MLP (1x1 convs),
    # channels-first so HW stays on the 128-lane axis.  One batched MXU
    # contraction per layer (TB is the batch dim) instead of TB tiny dots.
    w1 = jnp.broadcast_to(w1t_ref[...][None], (tb,) + w1t_ref.shape)   # (TB, CH, C)
    w2 = jnp.broadcast_to(w2t_ref[...][None], (tb,) + w2t_ref.shape)   # (TB, C, CH)
    temb = jax.nn.silu(t * wt_ref[...][None])                          # (TB, CH, 1)

    h = jnp.einsum('bhc,bcs->bhs', w1, x_t,
                   preferred_element_type=jnp.float32)                 # (TB, CH, HWt)
    h = jax.nn.silu(h + b1_ref[...][None] + temb)
    pred = jnp.einsum('bch,bhs->bcs', w2, h,
                      preferred_element_type=jnp.float32)              # (TB, C, HWt)
    pred = pred + b2_ref[...][None]

    d = pred - u_t
    # Reduce the non-lane axes (TB, C) only; keep HW lane-dense so the
    # (1, 1, HWt) store is an unmasked vst.  Final tiny reduction is in XLA.
    part_ref[...] = jnp.sum(d * d * lw, axis=(0, 1), keepdims=True)


# --------------------------------------------------------------------------
# Tiling heuristics (per-generation VMEM aware)
# --------------------------------------------------------------------------
def _vmem_capacity_bytes():
    try:
        return int(pltpu.get_tpu_info().vmem_capacity_bytes)
    except Exception:
        return 64 << 20        # conservative fallback (v7x per-TensorCore VMEM)


def _pick_hw_tile(hw, max_tile=2048):
    # Full extent for small / non-128-multiple spatial sizes; otherwise the
    # largest 128-multiple divisor <= max_tile (bounds vreg/VMEM pressure and
    # provides extra parallel grid steps for pipelining / megacore sharding).
    if hw <= max_tile or hw % 128 != 0:
        return hw
    best = 128
    for d in range(128, max_tile + 1, 128):
        if hw % d == 0:
            best = d
    return best


def _per_tb_vmem_bytes(c, ch, hw_tile, itemsize):
    # Conservative per-batch-row VMEM cost of one grid step: sublane-padded,
    # double-buffered streamed blocks + f32 temporaries (x_t, u_t, h, pred, ...).
    sub_s = 8 * (4 // itemsize)                 # sublane tile for streamed dtype
    c_s = -(-c // sub_s) * sub_s
    c_f = -(-c // 8) * 8
    ch_f = -(-ch // 8) * 8
    streamed = 3 * 2 * c_s * hw_tile * itemsize     # 3 inputs, double-buffered
    temps = (8 * c_f + 3 * ch_f) * hw_tile * 4      # f32 intermediates
    return streamed + temps


def _pick_batch_tile(batch, per_tb_bytes, vmem_cap):
    budget = int(0.7 * vmem_cap) - (4 << 20)
    tb = max(1, min(batch, budget // max(per_tb_bytes, 1), 1024))
    if batch >= 2:
        tb = min(tb, (batch + 1) // 2)              # G >= 2 -> v7x second TC busy
    # Prefer >= 8 grid steps while the per-step working set stays large.
    while tb > 1 and -(-batch // tb) < 8 and (tb // 2) * per_tb_bytes >= (8 << 20):
        tb //= 2
    return max(tb, 1)


# --------------------------------------------------------------------------
# Wrapper
# --------------------------------------------------------------------------
def flow_matching_loss(trg_nchw, noise_nchw, t, loss_weight_nchw, params,
                       stream_dtype=STREAM_DTYPE):
    B, C, H, W = trg_nchw.shape
    HW = H * W
    w1t, b1, wt, w2t, b2 = params
    CH = w1t.shape[0]

    itemsize = jnp.dtype(stream_dtype).itemsize
    vmem_cap = _vmem_capacity_bytes()

    hw_tile = _pick_hw_tile(HW)
    S = HW // hw_tile
    per_tb = _per_tb_vmem_bytes(C, CH, hw_tile, itemsize)
    TB = _pick_batch_tile(B, per_tb, vmem_cap)
    G = pl.cdiv(B, TB)
    Bp = G * TB

    vmem_limit = int(min(0.9 * vmem_cap,
                         max(TB * per_tb + (6 << 20), 16 << 20)))

    # Free (contiguous) reshape NCHW -> (B, C, HW); no transpose in HBM.
    # Streamed tensors go to bf16; accumulation stays f32 inside the kernel.
    trg = trg_nchw.reshape(B, C, HW).astype(stream_dtype)
    noise = noise_nchw.reshape(B, C, HW).astype(stream_dtype)
    lw = loss_weight_nchw.reshape(B, C, HW).astype(stream_dtype)
    t3 = t.astype(jnp.float32).reshape(B, 1, 1)

    if Bp != B:
        # Zero-pad the ragged batch tail; lw == 0 makes its contribution 0.
        pad = ((0, Bp - B), (0, 0), (0, 0))
        trg = jnp.pad(trg, pad)
        noise = jnp.pad(noise, pad)
        lw = jnp.pad(lw, pad)
        t3 = jnp.pad(t3, pad)

    big_spec = pl.BlockSpec((TB, C, hw_tile), lambda g, s: (g, 0, s))

    def full2d(shape):
        return pl.BlockSpec(shape, lambda g, s: (0, 0))

    partials = pl.pallas_call(
        fm_loss_kernel,
        out_shape=jax.ShapeDtypeStruct((G, 1, HW), jnp.float32),
        grid_spec=pltpu.PrefetchScalarGridSpec(
            num_scalar_prefetch=0,
            grid=(G, S),
            in_specs=[
                pl.BlockSpec((TB, 1, 1), lambda g, s: (g, 0, 0)),   # t
                big_spec,                                           # trg
                big_spec,                                           # noise
                big_spec,                                           # loss_weight
                full2d((CH, C)),                                    # w1t
                full2d((CH, 1)),                                    # b1
                full2d((CH, 1)),                                    # wt
                full2d((C, CH)),                                    # w2t
                full2d((C, 1)),                                     # b2
            ],
            out_specs=pl.BlockSpec((1, 1, hw_tile), lambda g, s: (g, 0, s)),
        ),
        compiler_params=pltpu.CompilerParams(
            dimension_semantics=("parallel", "parallel"),
            vmem_limit_bytes=vmem_limit),
    )(t3, trg, noise, lw, w1t, b1, wt, w2t, b2)

    # Tiny final reduction in XLA; normalize by the TRUE batch size.
    return jnp.sum(partials) / jnp.float32(B * C * HW)


# --------------------------------------------------------------------------
# Pure-JAX reference (same semantics, same bf16-quantized streamed inputs)
# --------------------------------------------------------------------------
def reference_loss(trg, noise, t, lw, params, stream_dtype=STREAM_DTYPE):
    w1t, b1, wt, w2t, b2 = params
    B, C, H, W = trg.shape
    q = lambda a: a.astype(stream_dtype).astype(jnp.float32)
    trg, noise, lw = q(trg), q(noise), q(lw)
    tb = t.reshape(B, 1, 1, 1).astype(jnp.float32)
    x_t = (1.0 - tb) * noise + tb * trg
    u_t = trg - noise
    x = x_t.reshape(B, C, H * W)
    temb = jax.nn.silu(t.reshape(B, 1, 1).astype(jnp.float32) * wt[None])
    h = jax.nn.silu(jnp.einsum('hc,bcs->bhs', w1t, x,
                               precision=jax.lax.Precision.HIGHEST)
                    + b1[None] + temb)
    pred = jnp.einsum('ch,bhs->bcs', w2t, h,
                      precision=jax.lax.Precision.HIGHEST) + b2[None]
    return jnp.mean((pred - u_t.reshape(B, C, H * W)) ** 2
                    * lw.reshape(B, C, H * W))


def skewed_timestep_sample(key, num_samples):
    # matches skewed_timestep_sample semantics (P_mean=-1.2, P_std=1.2)
    rnd = jax.random.normal(key, (num_samples,), jnp.float32)
    sigma = jnp.exp(rnd * 1.2 + (-1.2))
    time = 1.0 / (1.0 + sigma)
    return jnp.clip(time, 0.0001, 1.0)


if __name__ == "__main__":
    B, C, H, W = 2, 4, 16, 16
    CH = 32  # hidden width of the stand-in backbone

    key = jax.random.PRNGKey(0)
    k = jax.random.split(key, 8)

    trg = jax.random.normal(k[0], (B, C, H, W), jnp.float32)          # target x_1
    noise = jax.random.normal(k[1], (B, C, H, W), jnp.float32)        # x_0
    t = skewed_timestep_sample(k[2], B)                               # skewed t
    loss_weight = 1.0 + 0.1 * jax.random.uniform(k[3], (B, C, H, W), jnp.float32)

    # deterministic synthetic backbone parameters (channels-first orientation)
    w1t = 0.1 * jax.random.normal(k[4], (CH, C), jnp.float32)
    b1 = jnp.zeros((CH, 1), jnp.float32)
    wt = 0.1 * jax.random.normal(k[5], (CH, 1), jnp.float32)
    w2t = 0.1 * jax.random.normal(k[6], (C, CH), jnp.float32)
    b2 = jnp.zeros((C, 1), jnp.float32)
    params = (w1t, b1, wt, w2t, b2)

    loss = flow_matching_loss(trg, noise, t, loss_weight, params)
    loss = jax.block_until_ready(loss)

    ref = reference_loss(trg, noise, t, loss_weight, params)
    assert jnp.allclose(loss, ref, rtol=2e-3, atol=1e-5), (loss, ref)

    print("KERNEL_OK")
</pallas_src>

<mosaic_0001>
module attributes {stable_mosaic.version = 11 : i64} {
  func.func @fm_loss_kernel(%arg0: i32, %arg1: i32, %arg2: memref<1x1x1xf32, #tpu.memory_space<vmem>>, %arg3: memref<1x4x256xbf16, #tpu.memory_space<vmem>>, %arg4: memref<1x4x256xbf16, #tpu.memory_space<vmem>>, %arg5: memref<1x4x256xbf16, #tpu.memory_space<vmem>>, %arg6: memref<32x4xf32, #tpu.memory_space<vmem>>, %arg7: memref<32x1xf32, #tpu.memory_space<vmem>>, %arg8: memref<32x1xf32, #tpu.memory_space<vmem>>, %arg9: memref<4x32xf32, #tpu.memory_space<vmem>>, %arg10: memref<4x1xf32, #tpu.memory_space<vmem>>, %arg11: memref<1x1x256xf32, #tpu.memory_space<vmem>>) attributes {dimension_semantics = [#tpu.dimension_semantics<parallel>, #tpu.dimension_semantics<parallel>], iteration_bounds = array<i64: 2, 1>, scalar_prefetch = 0 : i64, scratch_operands = 0 : i64, tpu.core_type = #tpu.core_type<tc>, window_params = [{transform_indices = @transform_0, window_bounds = array<i64: 1, 1, 1>}, {transform_indices = @transform_1, window_bounds = array<i64: 1, 4, 256>}, {transform_indices = @transform_2, window_bounds = array<i64: 1, 4, 256>}, {transform_indices = @transform_3, window_bounds = array<i64: 1, 4, 256>}, {pipeline_mode = #tpu.pipeline_mode<synchronous>, transform_indices = @transform_4, window_bounds = array<i64: 32, 4>}, {pipeline_mode = #tpu.pipeline_mode<synchronous>, transform_indices = @transform_5, window_bounds = array<i64: 32, 1>}, {pipeline_mode = #tpu.pipeline_mode<synchronous>, transform_indices = @transform_6, window_bounds = array<i64: 32, 1>}, {pipeline_mode = #tpu.pipeline_mode<synchronous>, transform_indices = @transform_7, window_bounds = array<i64: 4, 32>}, {pipeline_mode = #tpu.pipeline_mode<synchronous>, transform_indices = @transform_8, window_bounds = array<i64: 4, 1>}, {transform_indices = @transform_9, window_bounds = array<i64: 1, 1, 256>}]} {
    %c0 = arith.constant 0 : index
    %c0_0 = arith.constant 0 : index
    %c0_1 = arith.constant 0 : index
    %0 = vector.load %arg3[%c0, %c0_0, %c0_1] : memref<1x4x256xbf16, #tpu.memory_space<vmem>>, vector<1x4x256xbf16>
    %1 = arith.extf %0 : vector<1x4x256xbf16> to vector<1x4x256xf32>
    %c0_2 = arith.constant 0 : index
    %c0_3 = arith.constant 0 : index
    %c0_4 = arith.constant 0 : index
    %2 = vector.load %arg4[%c0_2, %c0_3, %c0_4] : memref<1x4x256xbf16, #tpu.memory_space<vmem>>, vector<1x4x256xbf16>
    %3 = arith.extf %2 : vector<1x4x256xbf16> to vector<1x4x256xf32>
    %c0_5 = arith.constant 0 : index
    %c0_6 = arith.constant 0 : index
    %c0_7 = arith.constant 0 : index
    %4 = vector.load %arg5[%c0_5, %c0_6, %c0_7] : memref<1x4x256xbf16, #tpu.memory_space<vmem>>, vector<1x4x256xbf16>
    %5 = arith.extf %4 : vector<1x4x256xbf16> to vector<1x4x256xf32>
    %c0_8 = arith.constant 0 : index
    %c0_9 = arith.constant 0 : index
    %c0_10 = arith.constant 0 : index
    %6 = vector.load %arg2[%c0_8, %c0_9, %c0_10] : memref<1x1x1xf32, #tpu.memory_space<vmem>>, vector<1x1x1xf32>
    %cst = arith.constant 1.000000e+00 : f32
    %7 = vector.broadcast %cst : f32 to vector<1x1x1xf32>
    %8 = arith.subf %7, %6 : vector<1x1x1xf32>
    %9 = vector.broadcast %8 : vector<1x1x1xf32> to vector<1x4x256xf32>
    %10 = arith.mulf %9, %3 : vector<1x4x256xf32>
    %11 = vector.broadcast %6 : vector<1x1x1xf32> to vector<1x4x256xf32>
    %12 = arith.mulf %11, %1 : vector<1x4x256xf32>
    %13 = arith.addf %10, %12 : vector<1x4x256xf32>
    %14 = arith.subf %1, %3 : vector<1x4x256xf32>
    %c0_11 = arith.constant 0 : index
    %c0_12 = arith.constant 0 : index
    %15 = vector.load %arg6[%c0_11, %c0_12] : memref<32x4xf32, #tpu.memory_space<vmem>>, vector<32x4xf32>
    %16 = vector.shape_cast %15 : vector<32x4xf32> to vector<1x32x4xf32>
    %c0_13 = arith.constant 0 : index
    %c0_14 = arith.constant 0 : index
    %17 = vector.load %arg9[%c0_13, %c0_14] : memref<4x32xf32, #tpu.memory_space<vmem>>, vector<4x32xf32>
    %18 = vector.shape_cast %17 : vector<4x32xf32> to vector<1x4x32xf32>
    %c0_15 = arith.constant 0 : index
    %c0_16 = arith.constant 0 : index
    %19 = vector.load %arg8[%c0_15, %c0_16] : memref<32x1xf32, #tpu.memory_space<vmem>>, vector<32x1xf32>
    %20 = vector.shape_cast %19 : vector<32x1xf32> to vector<1x32x1xf32>
    %21 = vector.broadcast %6 : vector<1x1x1xf32> to vector<1x32x1xf32>
    %22 = arith.mulf %21, %20 : vector<1x32x1xf32>
    %23 = arith.negf %22 : vector<1x32x1xf32>
    %24 = math.exp %23 : vector<1x32x1xf32>
    %cst_17 = arith.constant 1.000000e+00 : f32
    %25 = vector.broadcast %cst_17 : f32 to vector<1x32x1xf32>
    %26 = arith.addf %25, %24 : vector<1x32x1xf32>
    %27 = arith.divf %25, %26 : vector<1x32x1xf32>
    %28 = arith.mulf %22, %27 : vector<1x32x1xf32>
    "tpu.trace_start"() <{level = 10 : i32, message = "bhc,bcs->bhs"}> : () -> ()
    %cst_18 = arith.constant dense<0.000000e+00> : vector<1x32x256xf32>
    %29 = tpu.matmul %16, %13, %cst_18 {dimension_numbers = #tpu.dot_dimension_numbers<[2], [1], [1], [2], [0, 0, 0, 1, 1, 2], [0], [0]>} : vector<1x32x4xf32>, vector<1x4x256xf32>, vector<1x32x256xf32> -> vector<1x32x256xf32>
    "tpu.trace_stop"() : () -> ()
    %c0_19 = arith.constant 0 : index
    %c0_20 = arith.constant 0 : index
    %30 = vector.load %arg7[%c0_19, %c0_20] : memref<32x1xf32, #tpu.memory_space<vmem>>, vector<32x1xf32>
    %31 = vector.shape_cast %30 : vector<32x1xf32> to vector<1x32x1xf32>
    %32 = vector.broadcast %31 : vector<1x32x1xf32> to vector<1x32x256xf32>
    %33 = arith.addf %29, %32 : vector<1x32x256xf32>
    %34 = vector.broadcast %28 : vector<1x32x1xf32> to vector<1x32x256xf32>
    %35 = arith.addf %33, %34 : vector<1x32x256xf32>
    %36 = arith.negf %35 : vector<1x32x256xf32>
    %37 = math.exp %36 : vector<1x32x256xf32>
    %cst_21 = arith.constant 1.000000e+00 : f32
    %38 = vector.broadcast %cst_21 : f32 to vector<1x32x256xf32>
    %39 = arith.addf %38, %37 : vector<1x32x256xf32>
    %40 = arith.divf %38, %39 : vector<1x32x256xf32>
    %41 = arith.mulf %35, %40 : vector<1x32x256xf32>
    "tpu.trace_start"() <{level = 10 : i32, message = "bch,bhs->bcs"}> : () -> ()
    %cst_22 = arith.constant dense<0.000000e+00> : vector<1x4x256xf32>
    %42 = tpu.matmul %18, %41, %cst_22 {dimension_numbers = #tpu.dot_dimension_numbers<[2], [1], [1], [2], [0, 0, 0, 1, 1, 2], [0], [0]>} : vector<1x4x32xf32>, vector<1x32x256xf32>, vector<1x4x256xf32> -> vector<1x4x256xf32>
    "tpu.trace_stop"() : () -> ()
    %c0_23 = arith.constant 0 : index
    %c0_24 = arith.constant 0 : index
    %43 = vector.load %arg10[%c0_23, %c0_24] : memref<4x1xf32, #tpu.memory_space<vmem>>, vector<4x1xf32>
    %44 = vector.shape_cast %43 : vector<4x1xf32> to vector<1x4x1xf32>
    %45 = vector.broadcast %44 : vector<1x4x1xf32> to vector<1x4x256xf32>
    %46 = arith.addf %42, %45 : vector<1x4x256xf32>
    %47 = arith.subf %46, %14 : vector<1x4x256xf32>
    %48 = arith.mulf %47, %47 : vector<1x4x256xf32>
    %49 = arith.mulf %48, %5 : vector<1x4x256xf32>
    %cst_25 = arith.constant dense<0.000000e+00> : vector<256xf32>
    %50 = vector.multi_reduction <add>, %49, %cst_25 [0, 1] : vector<1x4x256xf32> to vector<256xf32>
    %51 = vector.shape_cast %50 : vector<256xf32> to vector<1x1x256xf32>
    %c0_26 = arith.constant 0 : index
    %c0_27 = arith.constant 0 : index
    %c0_28 = arith.constant 0 : index
    %52 = vector.load %arg11[%c0_26, %c0_27, %c0_28] : memref<1x1x256xf32, #tpu.memory_space<vmem>>, vector<1x1x256xf32>
    tpu.vector_store %arg11[%c0_26, %c0_27, %c0_28], %51 {strides = array<i32>} : memref<1x1x256xf32, #tpu.memory_space<vmem>>, vector<1x1x256xf32>,
    return
  }
  func.func @transform_0(%arg0: i32, %arg1: i32) -> (i32, i32, i32) {
    %c0_i32 = arith.constant 0 : i32
    %c0_i32_0 = arith.constant 0 : i32
    %c0_i32_1 = arith.constant 0 : i32
    return %arg0, %c0_i32, %c0_i32_0 : i32, i32, i32
  }
  func.func @transform_1(%arg0: i32, %arg1: i32) -> (i32, i32, i32) {
    %c0_i32 = arith.constant 0 : i32
    %c0_i32_0 = arith.constant 0 : i32
    return %arg0, %c0_i32, %arg1 : i32, i32, i32
  }
  func.func @transform_2(%arg0: i32, %arg1: i32) -> (i32, i32, i32) {
    %c0_i32 = arith.constant 0 : i32
    %c0_i32_0 = arith.constant 0 : i32
    return %arg0, %c0_i32, %arg1 : i32, i32, i32
  }
  func.func @transform_3(%arg0: i32, %arg1: i32) -> (i32, i32, i32) {
    %c0_i32 = arith.constant 0 : i32
    %c0_i32_0 = arith.constant 0 : i32
    return %arg0, %c0_i32, %arg1 : i32, i32, i32
  }
  func.func @transform_4(%arg0: i32, %arg1: i32) -> (i32, i32) {
    %c0_i32 = arith.constant 0 : i32
    %c0_i32_0 = arith.constant 0 : i32
    %c0_i32_1 = arith.constant 0 : i32
    return %c0_i32, %c0_i32_0 : i32, i32
  }
  func.func @transform_5(%arg0: i32, %arg1: i32) -> (i32, i32) {
    %c0_i32 = arith.constant 0 : i32
    %c0_i32_0 = arith.constant 0 : i32
    %c0_i32_1 = arith.constant 0 : i32
    return %c0_i32, %c0_i32_0 : i32, i32
  }
  func.func @transform_6(%arg0: i32, %arg1: i32) -> (i32, i32) {
    %c0_i32 = arith.constant 0 : i32
    %c0_i32_0 = arith.constant 0 : i32
    %c0_i32_1 = arith.constant 0 : i32
    return %c0_i32, %c0_i32_0 : i32, i32
  }
  func.func @transform_7(%arg0: i32, %arg1: i32) -> (i32, i32) {
    %c0_i32 = arith.constant 0 : i32
    %c0_i32_0 = arith.constant 0 : i32
    %c0_i32_1 = arith.constant 0 : i32
    return %c0_i32, %c0_i32_0 : i32, i32
  }
  func.func @transform_8(%arg0: i32, %arg1: i32) -> (i32, i32) {
    %c0_i32 = arith.constant 0 : i32
    %c0_i32_0 = arith.constant 0 : i32
    %c0_i32_1 = arith.constant 0 : i32
    return %c0_i32, %c0_i32_0 : i32, i32
  }
  func.func @transform_9(%arg0: i32, %arg1: i32) -> (i32, i32, i32) {
    %c0_i32 = arith.constant 0 : i32
    %c0_i32_0 = arith.constant 0 : i32
    return %arg0, %c0_i32, %arg1 : i32, i32, i32
  }
}

</mosaic_0001>

<bundles_post_ra>
// kernel: tpu_custom_call.1
= control target key start
LH: loop header
LB: loop body
LE: loop exit
PB: predicated region body
PF: predicated region fallthrough
CT: control target
= control target key end

     0   :  { %s1489_s0 = inlined_call_operand.vmem [shape: f32[2,1,1], index: 0, kind: input, shape index: {}]   ;;  %s1490_s1 = inlined_call_operand.vmem [shape: bf16[2,4,256], index: 1, kind: input, shape index: {}]   ;;  %s1491_s2 = inlined_call_operand.vmem [shape: bf16[2,4,256], index: 2, kind: input, shape index: {}]   ;;  %s1492_s3 = inlined_call_operand.vmem [shape: bf16[2,4,256], index: 3, kind: input, shape index: {}]   ;;  %s1493_s4 = inlined_call_operand.vmem [shape: f32[32,4], index: 4, kind: input, shape index: {}]   ;;  %s1494_s5 = inlined_call_operand.vmem [shape: f32[32,1], index: 5, kind: input, shape index: {}]   ;;  %s1495_s6 = inlined_call_operand.vmem [shape: f32[32,1], index: 6, kind: input, shape index: {}]   ;;  %s1496_s7 = inlined_call_operand.vmem [shape: f32[4,32], index: 7, kind: input, shape index: {}]   ;;  %s1497_s8 = inlined_call_operand.vmem [shape: f32[4,1], index: 8, kind: input, shape index: {}]   ;;  %s1498_s9 = inlined_call_operand.hbm [shape: f32[2,1,256], index: 9, kind: output, shape index: {}]  }
   0x1   :  { %1499 = sst [smem:[#allocation5_spill]] %s1489_s0 }
   0x2   :  { %14 = vsyncpa [#allocation3], 0 }
   0x3   :  { %16 = vsyncpa [#allocation3 + $0x1], 0  ;;  %s1285_s30 = smov 0   ;;  %s1287_s10 = smov 0  }
   0x4   :  { %s1289_s11 = smov 0   ;;  %s1291_s12 = smov 0  }
   0x5   :  { %s1293_s13 = smov 0   ;;  %s1295_s14 = smov 0  }
   0x6 LB: > { %s1005_s15 = sadd.s32 4294967295, %s1229_s14   ;;  %s1006_s16 = sadd.s32 4294967294, %s1229_s14   ;;  %s1229_s14 = sphi %s1295_s14, %s22_s14   ;;  %s1225_s13 = sphi %s1293_s13, %s1507_s13   ;;  %s1221_s12 = sphi %s1291_s12, %s1506_s12   ;;  %s1217_s11 = sphi %s1289_s11, %s1505_s11   ;;  %s1213_s10 = sphi %s1287_s10, %s1504_s10   ;;  %s1209_s30 = sphi %s1285_s30, %s1503_s30  }
   0x7   : > { %s34_s17 = sadd.s32 1, %s1225_s13  ;;  %s258_s18 = sadd.s32 1, %s1217_s11 }
   0x8   : > { %p36_p0 = scmp.ge.s32.totalorder %s34_s17, 2  ;;  %p268_p1 = scmp.ne.s32.totalorder %s1217_s11, %s1213_s10 }
   0x9   : > { %p269_p2 = scmp.eq.s32.totalorder %s1005_s15, 1  ;;  %p274_p3 = scmp.ne.s32.totalorder %s1213_s10, %s1209_s30 }
   0xa   : > { %s1509_s17 = smov (%p36_p0, %s34_s17), 0  ;;  %p275_p5 = scmp.eq.s32.totalorder %s1006_s16, 1 }
   0xb   : > { %p1325_p4 = por %p269_p2, %p268_p1  ;;  %s253_s20 = ssub.s32 %s1225_s13, %s1509_s17 }
   0xc   : > { %p1009_p6 = scmp.ge.s32.totalorder %s1229_s14, 1  ;;  %p256_p7 = scmp.eq.s32.totalorder %s253_s20, 0 }
   0xd   : > { %p1332_p8 = por %p275_p5, %p274_p3  ;;  %p353_p9 = scmp.lt.s32.totalorder %s1229_s14, 3 }
   0xe   : > { %s1338_s22 = scalar_select %p256_p7, %s1217_s11, %s258_s18  }
   0xf   : > { %p354_p10 = pnand %p1009_p6, %p353_p9 }
  0x10   : > { %p414_p11 = scmp.lt.s32.totalorder (!%p354_p10), %s1221_s12, 1  ;;  %s1502_s0 = sld [smem:[#allocation5_spill]] (!%p354_p10) }
  0x11   : > { %357 = sbr.rel (%p354_p10) target bundleno = 654 (0x28e), region = 56 }
  0x16   : > { %v457_v0 = vlaneseq  ;;  %v1231_v1 = vmov 0   ;;  %s1342_s23 = scalar_select %p414_p11, %s1221_s12, 1  ;;  %v486_v4 = vld [vmem:[%s1495_s6 + $0x18] sm:$0xff]  ;;  %v485_v6 = vld [vmem:[%s1495_s6 + $0x10] sm:$0xff]  ;;  %v484_v7 = vld [vmem:[%s1495_s6 + $0x8] sm:$0xff]  ;;  %v1232_v17 = vmov 0.0  }
  0x17   : > { %1103 = vset.pattern.permute.xlu0 %v1231_v1  ;;  %1104 = vset.pattern.permute.xlu1 %v1231_v1  ;;  %v523_v30 = vld [vmem:[%s1494_s5 + $0x18] sm:$0xff]  ;;  %v483_v31 = vld [vmem:[%s1495_s6] sm:$0xff]  ;;  %v522_v33 = vld [vmem:[%s1494_s5 + $0x10] sm:$0xff]  ;;  %vm559_vm0 = vcmask 1043456   ;;  %vm546_vm1 = vcmask 31744   ;;  %vm743_vm2 = vcmask 261120  }
  0x18   : > { %v1345_v2 = vshrl.u32 %v457_v0, 7  ;;  %s416_s26 = scalar_lea.vmem %s1502_s0, %s1342_s23  ;;  %628 = vmatprep.mubr.f32.mxu0 %v1232_v17  ;;  %811 = vmatprep.mubr.f32.mxu1 %v1232_v17  ;;  %v737_v32 = vld [vmem:[%s1497_s8] sm:$0xf]  ;;  %v521_v36 = vld [vmem:[%s1494_s5 + $0x8] sm:$0xff]  ;;  %s1382_s25 = sshll.u32 %s1342_s23, 2  ;;  %v480_v54 = vld [vmem:[%s1493_s4 + $0x10] sm:$0xff] }
  0x19   : > { %v454_v5 = vld [vmem:[%s416_s26] sm:$0x1]  ;;  %541 = vperm.xlu1 %1104, %v523_v30   ;;  %s435_s28 = scalar_lea.vmem %s1491_s2, %s1382_s25  ;;  %s425_s16 = scalar_lea.vmem %s1490_s1, %s1382_s25  ;;  %v479_v53 = vld [vmem:[%s1493_s4 + $0x8] sm:$0xff]  ;;  %v481_v55 = vld [vmem:[%s1493_s4 + $0x18] sm:$0xff]  ;;  %vm864_vm3 = vcmp.lt.s32.totalorder %v457_v0, 256 }
  0x1a   : > { %v459_v3 = vsub.s32 0, %v1345_v2  ;;  %v455_v8 = vsub.f32 1.0, %v454_v5  ;;  %v520_v37 = vld [vmem:[%s1494_s5] sm:$0xff]  ;;  %s445_s20 = scalar_lea.vmem %s1492_s3, %s1382_s25  ;;  %s411_s25 = sand.u32 1, %s1213_s10  }
  0x1b   : > { %v1392_v42 = vld [vmem:[%s435_s28] sm:$0xf]  ;;  %s1010_s24 = sshll.u32 %s411_s25, 1  ;;  %s1044_s26 = sshll.u32 %s1221_s12, 5 }
  0x1c   : > { %v470_v9 = vrot.slane %v454_v5, %v459_v3  ;;  %v460_v10 = vrot.slane %v455_v8, %v459_v3  ;;  %v1394_v43 = vld [vmem:[%s425_s16] sm:$0xf]  ;;  %v451_v45 = vunpack.c.l.bf16 %v1392_v42  ;;  %s413_s27 = scalar_lea.vmem [#allocation2], %s1010_s24  ;;  %s882_s16 = scalar_lea.hbm %s1498_s9, %s1044_s26 }
  0x1d   : > { %536 = vperm.xlu1 %1104, %v522_v33   ;;  %v449_v46 = vunpack.c.l.bf16 %v1394_v43  ;;  %v478_v52 = vld [vmem:[%s1493_s4] sm:$0xff]  ;;  %s884_s28 = sshll.u32 %s413_s27, 4  ;;  %s868_s23 = scalar_lea.sflag [#allocation3], %s411_s25  ;;  %s885_s28 = int_to_ptr.vmem [resolvable:$true] %s884_s28 }
  0x1e   : > { %v491_v11 = vmul.f32 %v486_v4, %v470_v9  ;;  %v490_v12 = vmul.f32 %v485_v6, %v470_v9  ;;  %v489_v13 = vmul.f32 %v484_v7, %v470_v9  ;;  %462 = vperm.xlu0 %1103, %v460_v10   ;;  %v488_v34 = vmul.f32 %v483_v31, %v470_v9  ;;  %s1153_s18 = scalar_lea.vmem %s885_s28, 32 }
  0x1f   : > { %p1154_p12 = scmp.ne.s32.totalorder %s885_s28, %s1153_s18 }
  0x20   : > { %v1020_v14 = vmul.f32 -1.442695, %v491_v11  ;;  %v1019_v15 = vmul.f32 -1.442695, %v490_v12  ;;  %v1018_v16 = vmul.f32 -1.442695, %v489_v13 }
  0x21   : > { %v1017_v35 = vmul.f32 -1.442695, %v488_v34  ;;  %531 = vperm.xlu1 %1104, %v521_v36   ;;  %p1155_p13 = pnand %p1154_p12, %p1325_p4 }
  0x22   : > { %1105 = vpow2.f32 %v1020_v14  ;;  %472 = vperm.xlu0 %1103, %v470_v9  }
  0x23   : > { %1107 = vpow2.f32 %v1019_v15  ;;  %p1156_p0 = pneg %p1155_p13 }
  0x24   : > { %1109 = vpow2.f32 %v1018_v16 }
  0x25   : > { %526 = vperm.xlu1 %1104, %v520_v37  }
  0x2f   : > { %v1106_v18 = vpop.eup %1105 }
  0x30   : > { %v1108_v19 = vpop.eup %1107  ;;  %v507_v20 = vadd.f32 1.0, %v1106_v18 }
  0x31   : > { %v1110_v21 = vpop.eup %1109  ;;  %v506_v22 = vadd.f32 1.0, %v1108_v19 }
  0x32   : > { %1111 = vrcp.f32 %v507_v20  ;;  %v505_v23 = vadd.f32 1.0, %v1110_v21 }
  0x33   : > { %1113 = vrcp.f32 %v506_v22 }
  0x34   : > { %1115 = vrcp.f32 %v505_v23 }
  0x35   : > { %1117 = vpow2.f32 %v1017_v35 }
  0x3f   : > { %v1112_v24 = vpop.eup %1111 }
  0x40   : > { %v1114_v25 = vpop.eup %1113  ;;  %v519_v26 = vmul.f32 %v1112_v24, %v491_v11 }
  0x41   : > { %v518_v27 = vmul.f32 %v1114_v25, %v490_v12  ;;  %v1116_v28 = vpop.eup %1115 }
  0x42   : > { %670 = vperm.xlu0 %1103, %v519_v26   ;;  %v517_v29 = vmul.f32 %v1116_v28, %v489_v13  ;;  %v1118_v38 = vpop.eup %1117 }
  0x43   : > { %v504_v39 = vadd.f32 1.0, %v1118_v38 }
  0x45   : > { %1119 = vrcp.f32 %v504_v39 }
  0x46   : > { %665 = vperm.xlu0 %1103, %v518_v27  }
  0x4a   : > { %660 = vperm.xlu0 %1103, %v517_v29  }
  0x4e   : > { %740 = vperm.xlu0 %1103, %v737_v32  }
  0x52   : > { %v1120_v40 = vpop.eup %1119 }
  0x53   : > { %v516_v41 = vmul.f32 %v1120_v40, %v488_v34 }
  0x55   : > { %655 = vperm.xlu1 %1104, %v516_v41  }
  0x94   : > { %v542_v56 = vpop.permute.xlu1 %541 }
  0x98   : > { %v537_v57 = vpop.permute.xlu1 %536 }
  0x99   : > { %v463_v44 = vpop.permute.xlu0 %462 }
  0x9a   : > { %v465_v48 = vmul.f32 %v463_v44, %v451_v45 }
  0x9c   : > { %v532_v58 = vpop.permute.xlu1 %531 }
  0x9d   : > { %v473_v47 = vpop.permute.xlu0 %472 }
  0x9e   : > { %v475_v49 = vmul.f32 %v473_v47, %v449_v46 }
  0xa0   : > { %v476_v50 = vadd.f32 %v475_v49, %v465_v48  ;;  %v527_v60 = vpop.permute.xlu1 %526 }
  0xa2   : > { %v545_v51 = vcombine.high %v476_v50, %v476_v50 }
  0xa4   : > { %1021 = vmatprep.subr.msk.mxu0 %vm559_vm0, %v545_v51 }
  0xa5   : > { %1022 = vmatpush1.msk.msra.mxu0 %vm559_vm0, %v476_v50 }
  0xa6   : > { %1023 = vmatmul.mubr.msk.f32.vlgmr.msra.gmra.mxu0 %vm546_vm1, %v478_v52 }
  0xa7   : > { %634 = vmatprep.mubr.f32.mxu0 %v1232_v17 }
  0xaa   : > { %1024 = vmatmul.mubr.msk.f32.gmra.mxu0 %vm546_vm1, %v479_v53 }
  0xab   : > { %640 = vmatprep.mubr.f32.mxu0 %v1232_v17 }
  0xae   : > { %1025 = vmatmul.mubr.msk.f32.gmra.mxu0 %vm546_vm1, %v480_v54 }
  0xaf   : > { %646 = vmatprep.mubr.f32.mxu0 %v1232_v17 }
  0xb2   : > { %1026 = vmatmul.mubr.msk.f32.gmra.mxu0 %vm546_vm1, %v481_v55 }
  0xbd   : > { %v671_v59 = vpop.permute.xlu0 %670 }
  0xc1   : > { %v666_v62 = vpop.permute.xlu0 %665 }
  0xc5   : > { %v661_v8 = vpop.permute.xlu0 %660 }
  0xd0   : > { %v656_v4 = vpop.permute.xlu1 %655 }
 0x166   : > { %v630_v61 = vpop.f32.mrf.mxu0 }
 0x167   : > { %v631_v13 = vadd.f32 %v630_v61, %v527_v60 }
 0x168   : > { %v632_v63 = vpop.f32.mrf.mxu0 }
 0x169   : > { %v633_v1 = vadd.f32 %v632_v63, %v527_v60  ;;  %v1427_v23 = vadd.f32 %v656_v4, %v631_v13 }
 0x16a   : > { %v636_v3 = vpop.f32.mrf.mxu0 }
 0x16b   : > { %v1419_v6 = vadd.f32 %v656_v4, %v633_v1  ;;  %v637_v9 = vadd.f32 %v636_v3, %v532_v58  ;;  %v1027_v32 = vmul.f32 -1.442695, %v1427_v23 }
 0x16c   : > { %v638_v5 = vpop.f32.mrf.mxu0 }
 0x16d   : > { %v639_v7 = vadd.f32 %v638_v5, %v532_v58  ;;  %v1028_v15 = vmul.f32 -1.442695, %v1419_v6  ;;  %v1424_v18 = vadd.f32 %v661_v8, %v637_v9  ;;  %v482_v9 = vld [vmem:[%s1496_s7] sm:$0xf] }
 0x16e   : > { %v642_v10 = vpop.f32.mrf.mxu0 }
 0x16f   : > { %v1421_v11 = vadd.f32 %v661_v8, %v639_v7  ;;  %v643_v12 = vadd.f32 %v642_v10, %v537_v57  ;;  %1121 = vpow2.f32 %v1028_v15  ;;  %v1029_v29 = vmul.f32 -1.442695, %v1424_v18  ;;  %v452_v10 = vld [vmem:[%s445_s20] sm:$0xf]  ;;  %s1234_s20 = smov [#allocation2]  }
 0x170   : > { %v644_v14 = vpop.f32.mrf.mxu0  ;;  %v453_v13 = vunpack.c.l.bf16 %v452_v10  ;;  %s1157_s12 = sshll.u32 %s1234_s20, 4  ;;  %s1158_s12 = int_to_ptr.vmem [resolvable:$false] %s1157_s12 }
 0x171   : > { %v677_v16 = vadd.f32 %v666_v62, %v643_v12  ;;  %v645_v17 = vadd.f32 %v644_v14, %v537_v57  ;;  %v1030_v19 = vmul.f32 -1.442695, %v1421_v11  ;;  %s1159_s24 = scalar_lea.vmem %s1158_s12, 64  ;;  %p1160_p1 = scmp.lt.s32.totalorder %s885_s28, %s1158_s12 }
 0x172   : > { %v648_v20 = vpop.f32.mrf.mxu0  ;;  %p1161_p2 = scmp.lt.s32.totalorder %s1159_s24, %s1153_s18 }
 0x173   : > { %v678_v21 = vadd.f32 %v666_v62, %v645_v17  ;;  %v649_v22 = vadd.f32 %v648_v20, %v542_v56  ;;  %v1031_v24 = vmul.f32 -1.442695, %v677_v16  ;;  %1123 = vpow2.f32 %v1030_v19 }
 0x174   : > { %v650_v25 = vpop.f32.mrf.mxu0  ;;  %p1162_p3 = por %p1161_p2, %p1160_p1 }
 0x175   : > { %v1032_v26 = vmul.f32 -1.442695, %v678_v21  ;;  %v679_v27 = vadd.f32 %v671_v59, %v649_v22  ;;  %v651_v28 = vadd.f32 %v650_v25, %v542_v56 }
 0x176   : > { %p1163_p5 = pnand %p1162_p3, %p1156_p0 }
 0x177   : > { %1125 = vpow2.f32 %v1032_v26  ;;  %v1033_v30 = vmul.f32 -1.442695, %v679_v27  ;;  %v680_v31 = vadd.f32 %v671_v59, %v651_v28  ;;  %v1233_v26 = vmov 1966171168  }
 0x178   : > { %1127 = vpow2.f32 %v1031_v24 }
 0x179   : > { %1129 = vpow2.f32 %v1033_v30  ;;  %v1034_v33 = vmul.f32 -1.442695, %v680_v31 }
 0x17a   : > { %1131 = vpow2.f32 %v1029_v29 }
 0x17b   : > { %1133 = vpow2.f32 %v1034_v33 }
 0x17c   : > { %1135 = vpow2.f32 %v1027_v32  ;;  %v1122_v34 = vpop.eup %1121 }
 0x17d   : > { %v706_v52 = vadd.f32 1.0, %v1122_v34 }
 0x180   : > { %v1124_v35 = vpop.eup %1123 }
 0x181   : > { %v708_v49 = vadd.f32 1.0, %v1124_v35 }
 0x184   : > { %v1126_v36 = vpop.eup %1125 }
 0x185   : > { %v1128_v37 = vpop.eup %1127  ;;  %v710_v38 = vadd.f32 1.0, %v1126_v36 }
 0x186   : > { %v1130_v39 = vpop.eup %1129  ;;  %v709_v47 = vadd.f32 1.0, %v1128_v37 }
 0x187   : > { %v1132_v40 = vpop.eup %1131  ;;  %v711_v41 = vadd.f32 1.0, %v1130_v39  ;;  %1137 = vrcp.f32 %v710_v38 }
 0x188   : > { %v1134_v44 = vpop.eup %1133  ;;  %v707_v51 = vadd.f32 1.0, %v1132_v40 }
 0x189   : > { %v1136_v48 = vpop.eup %1135  ;;  %v712_v50 = vadd.f32 1.0, %v1134_v44  ;;  %1139 = vrcp.f32 %v711_v41 }
 0x18a   : > { %v705_v53 = vadd.f32 1.0, %v1136_v48 }
 0x18b   : > { %1141 = vrcp.f32 %v712_v50 }
 0x18c   : > { %1143 = vrcp.f32 %v709_v47 }
 0x18d   : > { %1145 = vrcp.f32 %v708_v49 }
 0x18e   : > { %1147 = vrcp.f32 %v707_v51 }
 0x18f   : > { %1149 = vrcp.f32 %v706_v52 }
 0x190   : > { %1151 = vrcp.f32 %v705_v53 }
 0x194   : > { %v1138_v54 = vpop.eup %1137 }
 0x195   : > { %v734_v62 = vmul.f32 %v1138_v54, %v678_v21  ;;  %v826_v21 = vcombine.high %v453_v13, %v453_v13 }
 0x196   : > { %v1140_v55 = vpop.eup %1139 }
 0x197   : > { %v735_v60 = vmul.f32 %v1140_v55, %v679_v27  ;;  %v848_v27 = vunpack.c.l.s4 %v1233_v26 }
 0x198   : > { %v1142_v56 = vpop.eup %1141 }
 0x199   : > { %v1144_v57 = vpop.eup %1143  ;;  %v736_v58 = vmul.f32 %v1142_v56, %v680_v31  ;;  %v849_v32 = vunpack.c.0.s8 %v848_v27 }
 0x19a   : > { %v1146_v59 = vpop.eup %1145  ;;  %v733_v1 = vmul.f32 %v1144_v57, %v677_v16 }
 0x19b   : > { %v1148_v61 = vpop.eup %1147  ;;  %771 = vmatprep.subr.mxu1 %v736_v58  ;;  %v732_v4 = vmul.f32 %v1146_v59, %v1421_v11  ;;  %v741_v11 = vpop.permute.xlu0 %740  ;;  %v852_v36 = vsub.s32 %v849_v32, %v1345_v2 }
 0x19c   : > { %v1150_v63 = vpop.eup %1149  ;;  %772 = vmatpush1.msra.mxu1 %v735_v60  ;;  %v731_v5 = vmul.f32 %v1148_v61, %v1424_v18 }
 0x19d   : > { %v1152_v3 = vpop.eup %1151  ;;  %773 = vmatprep.subr.mxu1 %v734_v62  ;;  %v730_v7 = vmul.f32 %v1150_v63, %v1419_v6  ;;  %v477_v6 = vsub.f32 %v449_v46, %v451_v45 }
 0x19e   : > { %774 = vmatpush1.msra.mxu1 %v733_v1  ;;  %v729_v8 = vmul.f32 %v1152_v3, %v1427_v23 }
 0x19f   : > { %775 = vmatprep.subr.mxu1 %v732_v4  ;;  %v819_v15 = vcombine.high %v477_v6, %v477_v6 }
 0x1a0   : > { %776 = vmatpush1.msra.mxu1 %v731_v5 }
 0x1a1   : > { %777 = vmatprep.subr.mxu1 %v730_v7 }
 0x1a2   : > { %778 = vmatpush1.msra.mxu1 %v729_v8 }
 0x1a3   : > { %1035 = vmatmul.mubr.msk.f32.vlgmr.msra.gmra.mxu1 %vm743_vm2, %v482_v9 }
 0x263   : > { %v813_v12 = vpop.f32.mrf.mxu1 }
 0x264   : > { %v814_v14 = vadd.f32 %v813_v12, %v741_v11 }
 0x265   : > { %v815_v16 = vpop.f32.mrf.mxu1 }
 0x266   : > { %v821_v17 = vsub.f32 %v814_v14, %v477_v6  ;;  %v816_v18 = vadd.f32 %v815_v16, %v741_v11 }
 0x268   : > { %v823_v19 = vmul.f32 %v821_v17, %v821_v17  ;;  %v822_v20 = vsub.f32 %v816_v18, %v819_v15 }
 0x26a   : > { %v828_v22 = vmul.f32 %v823_v19, %v453_v13  ;;  %v824_v23 = vmul.f32 %v822_v20, %v822_v20 }
 0x26c   : > { %v830_v42 = vsel %vm559_vm0, %v828_v22, 0.0  ;;  %v829_v24 = vmul.f32 %v826_v21, %v824_v23 }
 0x26d   : > { %v831_v43 = vrot.slane %v830_v42, 4 }
 0x26e   : > { %v837_v45 = vsel %vm559_vm0, %v829_v24, 0.0 }
 0x26f   : > { %v832_v46 = vadd.f32 %v831_v43, %v830_v42  ;;  %v838_v25 = vrot.slane %v837_v45, 4 }
 0x271   : > { %v833_v28 = vrot.slane %v832_v46, 2  ;;  %v839_v29 = vadd.f32 %v838_v25, %v837_v45 }
 0x273   : > { %v834_v30 = vadd.f32 %v833_v28, %v832_v46  ;;  %v840_v31 = vrot.slane %v839_v29, 2 }
 0x275   : > { %v835_v33 = vrot.slane %v834_v30, 1  ;;  %v841_v34 = vadd.f32 %v840_v31, %v839_v29 }
 0x277   : > { %v842_v35 = vrot.slane %v841_v34, 1  ;;  %v836_v37 = vadd.f32 %v835_v33, %v834_v30 }
 0x279   : > { %v843_v38 = vadd.f32 %v842_v35, %v841_v34 }
 0x27b   : > { %v846_v39 = vcombine.low %v836_v37, %v843_v38 }
 0x27d   : > { %v853_v40 = vrot.slane %v846_v39, %v852_v36 }
 0x27f   : > { %v860_v41 = vrot.slane %v853_v40, %v852_v36 }
 0x281   : > { %866 = vst.msk [vmem:[%s413_s27] sm:$0x3] %vm864_vm3, %v860_v41 }
 0x282   : > { %1166 = shalt.err (!%p1163_p5)
}
 0x283   : > { %s1167_s0 = scalar_lea.hbm %s882_s16, 32  ;;  %s1171_s27 = scalar_lea.hbm %s1498_s9, 64 }
 0x284   : > { %p1168_p6 = scmp.ne.s32.totalorder %s882_s16, %s1167_s0  ;;  %p1172_p10 = scmp.lt.s32.totalorder %s882_s16, %s1498_s9 }
 0x285   : > { %p1173_p11 = scmp.lt.s32.totalorder %s1171_s27, %s1167_s0 }
 0x286   : > { %p1169_p7 = pnand %p1168_p6, %p1325_p4 }
 0x287   : > { %p1174_p12 = por %p1173_p11, %p1172_p10 }
 0x288   : > { %p1170_p9 = pneg %p1169_p7 }
 0x28a   : > { %p1175_p13 = pnand %p1174_p12, %p1170_p9 }
 0x28c   : > { %1178 = shalt.err (!%p1175_p13)
}
 0x28d   : > { %1045 = dma.vmem_to_hbm [thread:$0]  (%p1325_p4), %s885_s28, 32, %s882_s16, %s868_s23  }
 0x28e PF: > { %p1051_p0 = scmp.ge.s32.totalorder %s1229_s14, 2  ;;  %s896_s18 = sand.u32 1, %s1209_s30  }
 0x28f   : > { %s897_s20 = scalar_lea.sflag [#allocation3], %s896_s18 }
 0x290   : > { %p1048_p1 = pnand %p1051_p0, %p1332_p8 }
 0x292   : > { %p1049_p2 = pneg %p1048_p1 }
 0x294   : > { %1204 = dma.done.wait (%p1049_p2), %s897_s20, 32  }
 0x295   : > { %1206 = vsyncadd (%p1049_p2), %s897_s20, 4294967264  ;;  %s22_s14 = sadd.s32 1, %s1229_s14   ;;  %s1503_s30 = smov %s1213_s10 }
 0x296   : > { %p19_p3 = scmp.ge.s32.totalorder %s22_s14, 4   ;;  %s1504_s10 = smov %s1217_s11 }
 0x297   : > { %s1505_s11 = smov %s1338_s22  ;;  %s1506_s12 = smov %s1225_s13 }
 0x298   : > { %s1507_s13 = smov %s1509_s17  ;;  %21 = sbr.rel (!%p19_p3) target bundleno = 6 (0x6), region = 100 }
 0x29d   :  { %902 = vsyncpa [#allocation3], 1 }
 0x29e   :  { %904 = vsyncpa [#allocation3 + $0x1], 1 }

</bundles_post_ra>
